<compile_context>
chip_gen: v7x
topology: tpu7x:2x2x1
jax: 0.10.0
libtpu: 0.0.40
codegen_flags: <defaults>
</compile_context>

<pallas_src>
import jax
import jax.numpy as jnp
from jax.experimental import pallas as pl
from jax.experimental.pallas import tpu as pltpu

STATE_SIZE = 64
HIDDEN = 64
ACTION_SIZE = 3
OUT_PAD = 8                  # fc3 padded to 8 columns (not 128) -> 32 B/row writes
NEG_PAD = -1e30              # pad-bias value -> padded logits are argmax-safe
DEFAULT_BLOCK_BATCH = 8192   # ~12 MiB double-buffered @ f32; fits v5e/v6e/v7x VMEM
MIN_GRID_STEPS = 8           # keep >= 8 grid steps so v7x can split across 2 TCs


def _round_up(n, m):
    return ((n + m - 1) // m) * m


def dqn_kernel(x_ref, w1_ref, b1_ref, w2_ref, b2_ref, w3_ref, b3_ref, o_ref):
    # fc1 + ReLU. MXU accumulates in f32 regardless of the streamed dtype.
    h1 = jnp.dot(x_ref[...], w1_ref[...], preferred_element_type=jnp.float32)
    h1 = jnp.maximum(h1 + b1_ref[...], 0.0)
    # fc2 + ReLU (activations stay f32 between layers; no intermediate down-cast).
    h2 = jnp.dot(h1, w2_ref[...], preferred_element_type=jnp.float32)
    h2 = jnp.maximum(h2 + b2_ref[...], 0.0)
    # fc3 (8 padded output columns; pad bias = NEG_PAD so the slab is argmax-safe).
    out = jnp.dot(h2, w3_ref[...], preferred_element_type=jnp.float32)
    o_ref[...] = (out + b3_ref[...]).astype(o_ref.dtype)


def dqn_forward(x, params, *, block_batch=DEFAULT_BLOCK_BATCH,
                out_dtype=jnp.float32, return_padded=False):
    """Fused DQN forward.

    x:      (batch, STATE_SIZE); streamed in the caller's dtype (no wrapper cast).
    params: init_params output -> (w1, b1, w2, b2, w3_padded, b3_padded).
    Returns (batch, ACTION_SIZE), or the raw (batch, OUT_PAD) slab when
    return_padded=True (pad columns hold NEG_PAD, safe to feed to argmax).
    """
    w1, b1, w2, b2, w3p, b3p = params
    assert x.ndim == 2 and x.shape[1] == STATE_SIZE, x.shape
    assert w3p.shape == (HIDDEN, OUT_PAD) and b3p.shape == (1, OUT_PAD)
    batch = x.shape[0]

    x_item = jnp.dtype(x.dtype).itemsize
    out_item = jnp.dtype(out_dtype).itemsize
    # Sublane granule of the streamed activation tile (8 for f32, 16 for bf16).
    granule = max(8, 32 // x_item)

    # Batch tile: as big as block_batch allows, but small enough that the grid
    # has >= MIN_GRID_STEPS steps (v7x megacore sharding), always a multiple of
    # the sublane granule.  No wrapper padding of x: the last partial block is
    # handled by Pallas (input over-read is don't-care, output rows masked).
    tb = min(_round_up(block_batch, granule),
             _round_up(pl.cdiv(batch, MIN_GRID_STEPS), granule))
    tb = max(tb, granule)
    grid = (pl.cdiv(batch, tb),)

    # Weights/biases: constant index_map -> stay VMEM-resident across the grid.
    # NOTE: these could also use pipeline_mode=pl.Buffered(1) (never re-fetched);
    # skipped since the VMEM saving is ~100 KiB at these weight sizes.
    resident = lambda a: pl.BlockSpec(a.shape, lambda i: (0, 0))

    weight_bytes = sum(int(a.size) * jnp.dtype(a.dtype).itemsize
                       for a in (w1, b1, w2, b2, w3p, b3p))
    # Double-buffered tile footprint (output tile is lane-padded to 128 in VMEM).
    tile_bytes = 2 * (tb * STATE_SIZE * x_item + tb * 128 * out_item)
    vmem_limit = int(min(max(tile_bytes + 2 * weight_bytes + (8 << 20), 32 << 20),
                         48 << 20))

    cost = pl.CostEstimate(
        flops=2 * batch * (STATE_SIZE * HIDDEN + HIDDEN * HIDDEN + HIDDEN * OUT_PAD),
        transcendentals=0,
        bytes_accessed=batch * (STATE_SIZE * x_item + OUT_PAD * out_item) + weight_bytes,
    )

    out = pl.pallas_call(
        dqn_kernel,
        out_shape=jax.ShapeDtypeStruct((batch, OUT_PAD), out_dtype),
        grid=grid,
        in_specs=[
            pl.BlockSpec((tb, STATE_SIZE), lambda i: (i, 0)),   # streamed x tile
            resident(w1), resident(b1),
            resident(w2), resident(b2),
            resident(w3p), resident(b3p),
        ],
        out_specs=pl.BlockSpec((tb, OUT_PAD), lambda i: (i, 0)),
        compiler_params=pltpu.CompilerParams(
            dimension_semantics=("parallel",),
            vmem_limit_bytes=vmem_limit,
        ),
        cost_estimate=cost,
    )(x, w1, b1, w2, b2, w3p, b3p)

    if return_padded:
        return out                       # pad columns hold NEG_PAD (argmax-safe)
    return out[:, :ACTION_SIZE]          # tiny narrow copy (32 B -> 12 B per row)


def init_params(key, dtype=jnp.float32):
    """PyTorch nn.Linear-style init U(-1/sqrt(fan_in), 1/sqrt(fan_in)), stored
    in kernel layout: weights (in, out), biases (1, out).  fc3 is pre-padded to
    OUT_PAD columns (zero weight cols, NEG_PAD bias cols) and weights pre-cast,
    so the forward wrapper never runs per-call pad/cast passes."""
    def linear(k, fan_in, fan_out):
        kw, kb = jax.random.split(k)
        bound = 1.0 / jnp.sqrt(jnp.float32(fan_in))
        w = jax.random.uniform(kw, (fan_in, fan_out), jnp.float32, -bound, bound)
        b = jax.random.uniform(kb, (1, fan_out), jnp.float32, -bound, bound)
        return w, b

    k1, k2, k3 = jax.random.split(key, 3)
    w1, b1 = linear(k1, STATE_SIZE, HIDDEN)
    w2, b2 = linear(k2, HIDDEN, HIDDEN)
    w3, b3 = linear(k3, HIDDEN, ACTION_SIZE)
    w3p = jnp.pad(w3, ((0, 0), (0, OUT_PAD - ACTION_SIZE)))
    b3p = jnp.pad(b3, ((0, 0), (0, OUT_PAD - ACTION_SIZE)), constant_values=NEG_PAD)
    cast = lambda a: a.astype(dtype)
    # Biases stay f32: they are added to the f32 accumulator inside the kernel.
    return (cast(w1), b1, cast(w2), b2, cast(w3p), b3p)


def dqn_reference(x, params):
    """Pure-JAX reference matching the PyTorch forward."""
    w1, b1, w2, b2, w3p, b3p = params
    hp = jax.lax.Precision.HIGHEST
    xf = x.astype(jnp.float32)
    h1 = jnp.maximum(jnp.dot(xf, w1.astype(jnp.float32), precision=hp) + b1, 0.0)
    h2 = jnp.maximum(jnp.dot(h1, w2.astype(jnp.float32), precision=hp) + b2, 0.0)
    out = jnp.dot(h2, w3p.astype(jnp.float32), precision=hp) + b3p
    return out[:, :ACTION_SIZE]


if __name__ == "__main__":
    key = jax.random.PRNGKey(0)
    k_params, k_x = jax.random.split(key)
    params = init_params(k_params)

    # Small batch that exercises the partial-last-block path (20 rows -> tb=8,
    # grid=(3,), last output block masked) with no wrapper-side padding of x.
    batch = 20
    x = jax.random.normal(k_x, (batch, STATE_SIZE), jnp.float32)

    out = jax.block_until_ready(dqn_forward(x, params))
    ref = dqn_reference(x, params)
    assert out.shape == (batch, ACTION_SIZE)
    assert jnp.allclose(out, ref, atol=2e-4, rtol=2e-4), \
        float(jnp.max(jnp.abs(out - ref)))

    # Padded-slab path (no post-kernel slice): pad columns are NEG_PAD so the
    # slab can be fed straight into argmax for DQN action selection.
    slab = jax.block_until_ready(dqn_forward(x, params, return_padded=True))
    assert slab.shape == (batch, OUT_PAD)
    assert jnp.allclose(slab[:, :ACTION_SIZE], ref, atol=2e-4, rtol=2e-4)
    assert bool(jnp.all(slab[:, ACTION_SIZE:] < -1e29))

    print("KERNEL_OK")
</pallas_src>

<mosaic_0001>
module attributes {stable_mosaic.version = 11 : i64} {
  func.func @dqn_kernel(%arg0: i32, %arg1: memref<8x64xf32, #tpu.memory_space<vmem>>, %arg2: memref<64x64xf32, #tpu.memory_space<vmem>>, %arg3: memref<1x64xf32, #tpu.memory_space<vmem>>, %arg4: memref<64x64xf32, #tpu.memory_space<vmem>>, %arg5: memref<1x64xf32, #tpu.memory_space<vmem>>, %arg6: memref<64x8xf32, #tpu.memory_space<vmem>>, %arg7: memref<1x8xf32, #tpu.memory_space<vmem>>, %arg8: memref<8x8xf32, #tpu.memory_space<vmem>>) attributes {dimension_semantics = [#tpu.dimension_semantics<parallel>], iteration_bounds = array<i64: 3>, scalar_prefetch = 0 : i64, scratch_operands = 0 : i64, tpu.core_type = #tpu.core_type<tc>, window_params = [{transform_indices = @transform_0, window_bounds = array<i64: 8, 64>}, {pipeline_mode = #tpu.pipeline_mode<synchronous>, transform_indices = @transform_1, window_bounds = array<i64: 64, 64>}, {pipeline_mode = #tpu.pipeline_mode<synchronous>, transform_indices = @transform_2, window_bounds = array<i64: 1, 64>}, {pipeline_mode = #tpu.pipeline_mode<synchronous>, transform_indices = @transform_3, window_bounds = array<i64: 64, 64>}, {pipeline_mode = #tpu.pipeline_mode<synchronous>, transform_indices = @transform_4, window_bounds = array<i64: 1, 64>}, {pipeline_mode = #tpu.pipeline_mode<synchronous>, transform_indices = @transform_5, window_bounds = array<i64: 64, 8>}, {pipeline_mode = #tpu.pipeline_mode<synchronous>, transform_indices = @transform_6, window_bounds = array<i64: 1, 8>}, {transform_indices = @transform_7, window_bounds = array<i64: 8, 8>}]} {
    %c0 = arith.constant 0 : index
    %c0_0 = arith.constant 0 : index
    %0 = vector.load %arg1[%c0, %c0_0] : memref<8x64xf32, #tpu.memory_space<vmem>>, vector<8x64xf32>
    %c0_1 = arith.constant 0 : index
    %c0_2 = arith.constant 0 : index
    %1 = vector.load %arg2[%c0_1, %c0_2] : memref<64x64xf32, #tpu.memory_space<vmem>>, vector<64x64xf32>
    %cst = arith.constant dense<0.000000e+00> : vector<8x64xf32>
    %2 = tpu.matmul %0, %1, %cst {dimension_numbers = #tpu.dot_dimension_numbers<[1], [0], [0], [1], [0, 0, 1, 1], [], []>} : vector<8x64xf32>, vector<64x64xf32>, vector<8x64xf32> -> vector<8x64xf32>
    %c0_3 = arith.constant 0 : index
    %c0_4 = arith.constant 0 : index
    %3 = vector.load %arg3[%c0_3, %c0_4] : memref<1x64xf32, #tpu.memory_space<vmem>>, vector<1x64xf32>
    %4 = vector.broadcast %3 : vector<1x64xf32> to vector<8x64xf32>
    %5 = arith.addf %2, %4 : vector<8x64xf32>
    %cst_5 = arith.constant 0.000000e+00 : f32
    %6 = vector.broadcast %cst_5 : f32 to vector<8x64xf32>
    %7 = arith.maximumf %5, %6 : vector<8x64xf32>
    %c0_6 = arith.constant 0 : index
    %c0_7 = arith.constant 0 : index
    %8 = vector.load %arg4[%c0_6, %c0_7] : memref<64x64xf32, #tpu.memory_space<vmem>>, vector<64x64xf32>
    %cst_8 = arith.constant dense<0.000000e+00> : vector<8x64xf32>
    %9 = tpu.matmul %7, %8, %cst_8 {dimension_numbers = #tpu.dot_dimension_numbers<[1], [0], [0], [1], [0, 0, 1, 1], [], []>} : vector<8x64xf32>, vector<64x64xf32>, vector<8x64xf32> -> vector<8x64xf32>
    %c0_9 = arith.constant 0 : index
    %c0_10 = arith.constant 0 : index
    %10 = vector.load %arg5[%c0_9, %c0_10] : memref<1x64xf32, #tpu.memory_space<vmem>>, vector<1x64xf32>
    %11 = vector.broadcast %10 : vector<1x64xf32> to vector<8x64xf32>
    %12 = arith.addf %9, %11 : vector<8x64xf32>
    %cst_11 = arith.constant 0.000000e+00 : f32
    %13 = vector.broadcast %cst_11 : f32 to vector<8x64xf32>
    %14 = arith.maximumf %12, %13 : vector<8x64xf32>
    %c0_12 = arith.constant 0 : index
    %c0_13 = arith.constant 0 : index
    %15 = vector.load %arg6[%c0_12, %c0_13] : memref<64x8xf32, #tpu.memory_space<vmem>>, vector<64x8xf32>
    %cst_14 = arith.constant dense<0.000000e+00> : vector<8x8xf32>
    %16 = tpu.matmul %14, %15, %cst_14 {dimension_numbers = #tpu.dot_dimension_numbers<[1], [0], [0], [1], [0, 0, 1, 1], [], []>} : vector<8x64xf32>, vector<64x8xf32>, vector<8x8xf32> -> vector<8x8xf32>
    %c0_15 = arith.constant 0 : index
    %c0_16 = arith.constant 0 : index
    %17 = vector.load %arg7[%c0_15, %c0_16] : memref<1x8xf32, #tpu.memory_space<vmem>>, vector<1x8xf32>
    %18 = vector.broadcast %17 : vector<1x8xf32> to vector<8x8xf32>
    %19 = arith.addf %16, %18 : vector<8x8xf32>
    %c0_17 = arith.constant 0 : index
    %c0_18 = arith.constant 0 : index
    %20 = vector.load %arg8[%c0_17, %c0_18] : memref<8x8xf32, #tpu.memory_space<vmem>>, vector<8x8xf32>
    tpu.vector_store %arg8[%c0_17, %c0_18], %19 {strides = array<i32>} : memref<8x8xf32, #tpu.memory_space<vmem>>, vector<8x8xf32>,
    return
  }
  func.func @transform_0(%arg0: i32) -> (i32, i32) {
    %c0_i32 = arith.constant 0 : i32
    %c0_i32_0 = arith.constant 0 : i32
    return %arg0, %c0_i32 : i32, i32
  }
  func.func @transform_1(%arg0: i32) -> (i32, i32) {
    %c0_i32 = arith.constant 0 : i32
    %c0_i32_0 = arith.constant 0 : i32
    %c0_i32_1 = arith.constant 0 : i32
    return %c0_i32, %c0_i32_0 : i32, i32
  }
  func.func @transform_2(%arg0: i32) -> (i32, i32) {
    %c0_i32 = arith.constant 0 : i32
    %c0_i32_0 = arith.constant 0 : i32
    %c0_i32_1 = arith.constant 0 : i32
    return %c0_i32, %c0_i32_0 : i32, i32
  }
  func.func @transform_3(%arg0: i32) -> (i32, i32) {
    %c0_i32 = arith.constant 0 : i32
    %c0_i32_0 = arith.constant 0 : i32
    %c0_i32_1 = arith.constant 0 : i32
    return %c0_i32, %c0_i32_0 : i32, i32
  }
  func.func @transform_4(%arg0: i32) -> (i32, i32) {
    %c0_i32 = arith.constant 0 : i32
    %c0_i32_0 = arith.constant 0 : i32
    %c0_i32_1 = arith.constant 0 : i32
    return %c0_i32, %c0_i32_0 : i32, i32
  }
  func.func @transform_5(%arg0: i32) -> (i32, i32) {
    %c0_i32 = arith.constant 0 : i32
    %c0_i32_0 = arith.constant 0 : i32
    %c0_i32_1 = arith.constant 0 : i32
    return %c0_i32, %c0_i32_0 : i32, i32
  }
  func.func @transform_6(%arg0: i32) -> (i32, i32) {
    %c0_i32 = arith.constant 0 : i32
    %c0_i32_0 = arith.constant 0 : i32
    %c0_i32_1 = arith.constant 0 : i32
    return %c0_i32, %c0_i32_0 : i32, i32
  }
  func.func @transform_7(%arg0: i32) -> (i32, i32) {
    %c0_i32 = arith.constant 0 : i32
    %c0_i32_0 = arith.constant 0 : i32
    return %arg0, %c0_i32 : i32, i32
  }
}

</mosaic_0001>

<bundles_post_ra>
// kernel: tpu_custom_call.1
= control target key start
LH: loop header
LB: loop body
LE: loop exit
PB: predicated region body
PF: predicated region fallthrough
CT: control target
= control target key end

     0   :  { %12 = vsyncpa [#allocation3], 0  ;;  %s1211_s0 = inlined_call_operand.hbm [shape: f32[20,64], index: 0, kind: input, shape index: {}]   ;;  %s1212_s1 = inlined_call_operand.vmem [shape: f32[64,64], index: 1, kind: input, shape index: {}]   ;;  %s1213_s2 = inlined_call_operand.vmem [shape: f32[1,64], index: 2, kind: input, shape index: {}]   ;;  %s1214_s3 = inlined_call_operand.hbm [shape: f32[64,64], index: 3, kind: input, shape index: {}]   ;;  %s1215_s4 = inlined_call_operand.vmem [shape: f32[1,64], index: 4, kind: input, shape index: {}]   ;;  %s1216_s5 = inlined_call_operand.vmem [shape: f32[64,8], index: 5, kind: input, shape index: {}]   ;;  %s1217_s6 = inlined_call_operand.vmem [shape: f32[1,8], index: 6, kind: input, shape index: {}]   ;;  %s1218_s7 = inlined_call_operand.vmem [shape: f32[20,8], index: 7, kind: output, shape index: {}]  }
   0x1   :  { %14 = vsyncpa [#allocation3 + $0x1], 0 }
   0x2   :  { %15 = vsyncpa [#allocation5], 0  ;;  %s992_s24 = smov 0   ;;  %s994_s25 = smov 0  }
   0x3   :  { %s996_s26 = smov 0   ;;  %s998_s27 = smov 0  }
   0x4 LB: > { %s1011_s28 = sadd.s32 4294967295, %s943_s27   ;;  %p41_p0 = scmp.ne.s32.totalorder %s935_s25, %s931_s24  ;;  %s943_s27 = sphi %s998_s27, %s1233_s27   ;;  %s939_s26 = sphi %s996_s26, %s1232_s26   ;;  %s935_s25 = sphi %s994_s25, %s1231_s25   ;;  %s931_s24 = sphi %s992_s24, %s1230_s24  }
   0x5   : > { %p1219_p1 = scmp.eq.s32.totalorder %s1011_s28, 0  ;;  %p655_p2 = scmp.ge.s32.totalorder %s943_s27, 1 }
   0x6   : > { %p204_p3 = scmp.lt.s32.totalorder %s943_s27, 4  ;;  %s945_s8 = smov [#allocation4]  }
   0x7   : > { %p1019_p4 = por %p1219_p1, %p41_p0  ;;  %s222_s9 = sshll.u32 %s945_s8, 4  ;;  %s223_s9 = int_to_ptr.vmem [resolvable:$true] %s222_s9 }
   0x8   : > { %p1023_p5 = pnand %p655_p2, %p204_p3  ;;  %s1036_s11 = sadd.s32 1, %s943_s27  }
   0x9   : > { %s1222_s29 = scalar_select %p1019_p4, 1, 0 }
   0xa   : > { %s1223_s30 = scalar_select %p1023_p5, 1, 0 }
   0xb   : > { %p798_p6 = pneg %p1023_p5  ;;  %s28_s12 = sadd.s32 1, %s939_s26 }
   0xc   : > { %s25_s13 = ssub.s32 %s943_s27, %s1036_s11  ;;  %s847_s16 = scalar_lea.hbm %s1214_s3, 1024 }
   0xd   : > { %p1031_p7 = pnand %p798_p6, %p1219_p1  ;;  %p848_p8 = scmp.ne.s32.totalorder %s1214_s3, %s847_s16 }
   0xe   : > { %p854_p12 = scmp.lt.u32.totalorder %s847_s16, %s1214_s3 }
   0xf   : > { %p849_p9 = pneg %p1031_p7 }
  0x11   : > { %p850_p10 = pnand %p849_p9, %p848_p8 }
  0x13   : > { %p851_p11 = pneg %p850_p10 }
  0x15   : > { %p856_p13 = pnand %p854_p12, %p851_p11 }
  0x17   : > { %859 = shalt.err (!%p856_p13)
}
  0x18   : > { %s860_s21 = scalar_lea.vmem %s223_s9, 1024  ;;  %p868_p6 = scmp.lt.s32.totalorder %s223_s9, %s223_s9 }
  0x19   : > { %p861_p0 = scmp.ne.s32.totalorder %s223_s9, %s860_s21  ;;  %p869_p1 = scmp.lt.s32.totalorder %s860_s21, %s860_s21 }
  0x1b   : > { %p863_p2 = pnand %p861_p0, %p849_p9  ;;  %p870_p4 = por %p869_p1, %p868_p6 }
  0x1d   : > { %p864_p3 = pneg %p863_p2 }
  0x1f   : > { %p871_p5 = pnand %p870_p4, %p864_p3 }
  0x21   : > { %874 = shalt.err (!%p871_p5)
}
  0x22   : > { %s946_s22 = smov 128   ;;  %s947_s23 = smov 8  }
  0x23   : > { %801 = dma.hbm_to_vmem [thread:$0]  (!%p1031_p7), %s1214_s3, 1024, %s223_s9, [#allocation5], %s946_s22, %s946_s22, %s947_s23  }
  0x24   : > { %p26_p8 = scmp.eq.s32.totalorder %s25_s13, 0  ;;  %p35_p9 = scmp.ne.s32.totalorder %s939_s26, %s935_s25 }
  0x25   : > { %p36_p1 = scmp.eq.s32.totalorder %s943_s27, 0  ;;  %p807_p4 = scmp.lt.s32.totalorder %s943_s27, 3 }
  0x26   : > { %s1062_s14 = scalar_select %p26_p8, %s939_s26, %s28_s12  }
  0x27   : > { %p37_p5 = por %p36_p1, %p35_p9  ;;  %s245_s15 = sand.u32 1, %s939_s26  }
  0x28   : > { %s658_s16 = sshll.u32 %s245_s15, 3  ;;  %s659_s17 = sshll.u32 %s943_s27, 7 }
  0x29   : > { %s1069_s20 = scalar_lea.hbm %s1211_s0, %s659_s17  ;;  %s249_s9 = scalar_lea.vmem [#allocation2], %s658_s16 }
  0x2a   : > { %s256_s10 = sshll.u32 %s249_s9, 4  ;;  %p1073_p7 = pnand %p807_p4, %p37_p5  ;;  %s1071_s10 = int_to_ptr.vmem [resolvable:$true] %s256_s10 }
  0x2b   : > { %s246_s27 = scalar_lea.sflag [#allocation3], %s245_s15  ;;  %s875_s13 = scalar_lea.hbm %s1069_s20, 128 }
  0x2c   : > { %p876_p10 = scmp.ne.s32.totalorder %s1069_s20, %s875_s13  ;;  %p877_p11 = pneg %p1073_p7 }
  0x2d   : > { %s880_s23 = scalar_lea.hbm %s1211_s0, 384  ;;  %p881_p0 = scmp.lt.u32.totalorder %s1069_s20, %s1211_s0 }
  0x2e   : > { %p878_p12 = pnand %p877_p11, %p876_p10  ;;  %p882_p2 = scmp.lt.u32.totalorder %s880_s23, %s875_s13 }
  0x2f   : > { %p884_p6 = scmp.lt.u32.totalorder %s875_s13, %s1069_s20 }
  0x30   : > { %p879_p13 = pneg %p878_p12  ;;  %p883_p3 = por %p882_p2, %p881_p0 }
  0x32   : > { %p885_p8 = por %p884_p6, %p883_p3 }
  0x34   : > { %p886_p9 = pnand %p885_p8, %p879_p13 }
  0x36   : > { %889 = shalt.err (!%p886_p9)
}
  0x37   : > { %s890_s15 = scalar_lea.vmem %s1071_s10, 128  ;;  %s948_s16 = smov [#allocation2]  }
  0x38   : > { %p891_p1 = scmp.ne.s32.totalorder %s1071_s10, %s890_s15  ;;  %s895_s17 = sshll.u32 %s948_s16, 4  ;;  %s896_s17 = int_to_ptr.vmem [resolvable:$false] %s895_s17 }
  0x39   : > { %s897_s18 = scalar_lea.vmem %s896_s17, 256  ;;  %p898_p10 = scmp.lt.s32.totalorder %s1071_s10, %s896_s17 }
  0x3a   : > { %p893_p4 = pnand %p891_p1, %p877_p11  ;;  %p899_p12 = scmp.lt.s32.totalorder %s897_s18, %s890_s15 }
  0x3c   : > { %p894_p5 = pneg %p893_p4  ;;  %p900_p0 = por %p899_p12, %p898_p10 }
  0x3e   : > { %p901_p2 = pnand %p900_p0, %p894_p5 }
  0x40   : > { %904 = shalt.err (!%p901_p2)
}
  0x41   : > { %805 = dma.hbm_to_vmem [thread:$0]  (!%p1073_p7), %s1069_s20, 128, %s1071_s10, %s246_s27  }
  0x42   : > { %p1226_p13 = scmp.ne.s32.totalorder %s1223_s30, 0 }
  0x43   : > { %s267_s19 = sand.u32 (!%p1226_p13), 1, %s935_s25   ;;  %p1227_p11 = scmp.ne.s32.totalorder (!%p1226_p13), %s1222_s29, 0 }
  0x44   : > { %265 = sbr.rel (%p1226_p13) target bundleno = 744 (0x2e8), region = 48  ;;  %s1105_s9 = sshll.u32 (!%p1226_p13), %s267_s19, 3 }
  0x45   : > { %s268_s13 = scalar_lea.sflag (!%p1226_p13), [#allocation3], %s267_s19  ;;  %s271_s21 = scalar_lea.vmem (!%p1226_p13), [#allocation2], %s1105_s9 }
  0x4b   : > { %922 = dma.done.wait (%p1227_p11), %s268_s13, 128  }
  0x4c   : > { %924 = vsyncadd (%p1227_p11), %s268_s13, 4294967168  ;;  %p1228_p3 = scmp.eq.s32.totalorder %s1011_s28, 0 }
  0x4e   : > { %926 = dma.done.wait (%p1228_p3), [#allocation5], 1024   ;;  %p1229_p7 = pmov %p1228_p3 }
  0x4f   : > { %v949_v0 = vmov 0.0|0.0   ;;  %vm950_vm0 = vmmov 0   ;;  %v951_v1 = vmov 0.0   ;;  %v310_v2 = vld [vmem:[%s1212_s1] sm:$0xff]  ;;  %v311_v3 = vld [vmem:[%s1212_s1 + $0x8] sm:$0xff]  ;;  %v312_v4 = vld [vmem:[%s1212_s1 + $0x10] sm:$0xff] }
  0x50   : > { %928 = vsyncadd (%p1229_p7), [#allocation5], 4294966272  ;;  %756 = vmatprep.subr.bf16.mxu0 %v949_v0  ;;  %715 = vmatprep.mubr.msk.f32.mxu0 %vm950_vm0, %v951_v1  ;;  %v757_v5 = vpack.c.bf16 %v311_v3, %v310_v2  ;;  %v313_v6 = vld [vmem:[%s1212_s1 + $0x18] sm:$0xff]  ;;  %v400_v8 = vld [vmem:[#allocation4] sm:$0xff]  ;;  %vm325_vm1 = vcmask 523264   ;;  %p305_p6 = scmp.lt.s32.totalorder %s1011_s28, 2 }
  0x51   : > { %768 = vmatprep.subr.bf16.mxu1 %v949_v0  ;;  %734 = vmatprep.mubr.msk.f32.mxu1 %vm950_vm0, %v951_v1  ;;  %v760_v7 = vpack.c.bf16 %v313_v6, %v312_v4  ;;  %v401_v9 = vld [vmem:[#allocation4 + $0x8] sm:$0xff]  ;;  %v402_v10 = vld [vmem:[#allocation4 + $0x10] sm:$0xff]  ;;  %v315_v12 = vld [vmem:[%s1212_s1 + $0x28] sm:$0xff]  ;;  %vm577_vm2 = vcmask 64512  }
  0x52   : > { %758 = vmatpush3.bf16.msra.mxu0 %v757_v5  ;;  %v314_v11 = vld [vmem:[%s1212_s1 + $0x20] sm:$0xff]  ;;  %v769_v13 = vpack.c.bf16 %v401_v9, %v400_v8  ;;  %v403_v14 = vld [vmem:[#allocation4 + $0x18] sm:$0xff]  ;;  %v404_v17 = vld [vmem:[#allocation4 + $0x20] sm:$0xff]  ;;  %s1235_s28 = smov (!%p305_p6, %s1011_s28), 2 }
  0x53   : > { %759 = vmatprep.subr.bf16.mxu0 %v949_v0  ;;  %v772_v15 = vpack.c.bf16 %v403_v14, %v402_v10  ;;  %v763_v16 = vpack.c.bf16 %v315_v12, %v314_v11  ;;  %v405_v18 = vld [vmem:[#allocation4 + $0x28] sm:$0xff]  ;;  %v316_v19 = vld [vmem:[%s1212_s1 + $0x30] sm:$0xff]  ;;  %v309_v23 = vld [vmem:[%s271_s21] sm:$0xff]  ;;  %s663_s20 = sshll.u32 %s1235_s28, 3 }
  0x54   : > { %770 = vmatpush3.bf16.msra.mxu1 %v769_v13  ;;  %v317_v20 = vld [vmem:[%s1212_s1 + $0x38] sm:$0xff]  ;;  %v775_v21 = vpack.c.bf16 %v405_v18, %v404_v17  ;;  %v406_v24 = vld [vmem:[#allocation4 + $0x30] sm:$0xff]  ;;  %v407_v25 = vld [vmem:[#allocation4 + $0x38] sm:$0xff]  ;;  %s308_s27 = scalar_lea.vmem %s1218_s7, %s663_s20 }
  0x55   : > { %771 = vmatprep.subr.bf16.mxu1 %v949_v0  ;;  %v766_v22 = vpack.c.bf16 %v317_v20, %v316_v19  ;;  %v778_v26 = vpack.c.bf16 %v407_v25, %v406_v24  ;;  %v489_v27 = vld [vmem:[%s1216_s5] sm:$0xff]  ;;  %v490_v28 = vld [vmem:[%s1216_s5 + $0x8] sm:$0xff]  ;;  %v491_v29 = vld [vmem:[%s1216_s5 + $0x10] sm:$0xff] }
  0x56   : > { %761 = vmatpush3.bf16.msra.mxu0 %v760_v7  ;;  %v781_v30 = vpack.c.bf16 %v490_v28, %v489_v27  ;;  %v492_v31 = vld [vmem:[%s1216_s5 + $0x18] sm:$0xff]  ;;  %v493_v33 = vld [vmem:[%s1216_s5 + $0x20] sm:$0xff]  ;;  %v494_v34 = vld [vmem:[%s1216_s5 + $0x28] sm:$0xff] }
  0x57   : > { %762 = vmatprep.subr.bf16.mxu0 %v949_v0  ;;  %v784_v32 = vpack.c.bf16 %v492_v31, %v491_v29  ;;  %v787_v35 = vpack.c.bf16 %v494_v34, %v493_v33  ;;  %v664_v36 = vld [vmem:[%s1213_s2] ss:$0 sm:$0xff]  ;;  %v495_v41 = vld [vmem:[%s1216_s5 + $0x30] sm:$0xff]  ;;  %v496_v42 = vld [vmem:[%s1216_s5 + $0x38] sm:$0xff] }
  0x58   : > { %773 = vmatpush3.bf16.msra.mxu1 %v772_v15  ;;  %v790_v43 = vpack.c.bf16 %v496_v42, %v495_v41  ;;  %v666_v44 = vld [vmem:[%s1215_s4] ss:$0 sm:$0xff] }
  0x59   : > { %774 = vmatprep.subr.bf16.mxu1 %v949_v0  ;;  %v668_v49 = vld [vmem:[%s1217_s6] ss:$0 sm:$0xff] }
  0x5a   : > { %764 = vmatpush3.bf16.msra.mxu0 %v763_v16 }
  0x5b   : > { %765 = vmatprep.subr.bf16.mxu0 %v949_v0 }
  0x5c   : > { %776 = vmatpush3.bf16.msra.mxu1 %v775_v21 }
  0x5d   : > { %777 = vmatprep.subr.bf16.mxu1 %v949_v0 }
  0x5e   : > { %767 = vmatpush3.bf16.msra.mxu0 %v766_v22 }
  0x5f   : > { %780 = vmatprep.subr.bf16.mxu0 %v949_v0 }
  0x60   : > { %779 = vmatpush3.bf16.msra.mxu1 %v778_v26 }
  0x61   : > { %716 = vmatmul.mubr.msk.f32.vlgmr.msra.gmra.mrb[0].mxu0 %vm325_vm1, %v309_v23 }
  0x62   : > { %753 = vmatprep.mubr.msk.f32.mxu0 %vm950_vm0, %v951_v1  ;;  %782 = vmatpush3.bf16.msra.mxu0 %v781_v30 }
  0x63   : > { %783 = vmatprep.subr.bf16.mxu0 %v949_v0 }
  0x66   : > { %785 = vmatpush3.bf16.msra.mxu0 %v784_v32 }
  0x67   : > { %786 = vmatprep.subr.bf16.mxu0 %v949_v0 }
  0x6a   : > { %788 = vmatpush3.bf16.msra.mxu0 %v787_v35 }
  0x6b   : > { %789 = vmatprep.subr.bf16.mxu0 %v949_v0 }
  0x6e   : > { %791 = vmatpush3.bf16.msra.mxu0 %v790_v43 }
 0x134   : > { %v395_v37 = vpop.f32.mrb[0].mxu0 }
 0x135   : > { %v396_v38 = vadd.f32 %v664_v36, %v395_v37  ;;  %v717_v39 = vpop.f32.mrb[1].mxu0 }
 0x137   : > { %v399_v40 = vmax.f32 %v396_v38, 0.0 }
 0x139   : > { %735 = vmatmul.mubr.msk.f32.vlgmr.msra.gmra.mrb[0].mxu1 %vm325_vm1, %v399_v40 }
 0x20c   : > { %v484_v45 = vpop.f32.mrb[0].mxu1 }
 0x20d   : > { %v485_v46 = vadd.f32 %v666_v44, %v484_v45  ;;  %v736_v47 = vpop.f32.mrb[1].mxu1 }
 0x20f   : > { %v488_v48 = vmax.f32 %v485_v46, 0.0 }
 0x211   : > { %754 = vmatmul.mubr.msk.f32.vlgmr.msra.gmra.mrb[2].mxu0 %vm325_vm1, %v488_v48 }
 0x2e4   : > { %v573_v50 = vpop.f32.mrb[2].mxu0 }
 0x2e5   : > { %v574_v51 = vadd.f32 %v668_v49, %v573_v50  ;;  %v755_v52 = vpop.f32.mrb[3].mxu0 }
 0x2e7   : > { %578 = vst.msk [vmem:[%s308_s27] sm:$0xff] %vm577_vm2, %v574_v51 }
 0x2e8 PF: > { %p18_p8 = scmp.ge.s32.totalorder %s1036_s11, 5   ;;  %s1230_s24 = smov %s935_s25 }
 0x2e9   : > { %s1231_s25 = smov %s939_s26  ;;  %s1232_s26 = smov %s1062_s14 }
 0x2ea   : > { %s1233_s27 = smov %s1036_s11  ;;  %20 = sbr.rel (!%p18_p8) target bundleno = 4 (0x4), region = 92 }
 0x2f1   :  { %598 = vsyncpa [#allocation3], 1 }
 0x2f2   :  { %600 = vsyncpa [#allocation3 + $0x1], 1 }
 0x2f3   :  { %601 = vsyncpa [#allocation5], 1 }

</bundles_post_ra>
